<compile_context>
chip_gen: v7x
topology: tpu7x:2x2x1
jax: 0.10.0
libtpu: 0.0.40
codegen_flags: <defaults>
</compile_context>

<pallas_src>
import functools

import jax
import jax.numpy as jnp
from jax.experimental import pallas as pl
from jax.experimental.pallas import tpu as pltpu


def dgm_kernel(x_ref, w1_ref, b1_ref, w2_ref, b2_ref, w3_ref, b3_ref,
               w7_ref, b7_ref, o_ref):
    # x_ref: (2, tile_b) f32 -- batch along lanes.
    x0 = x_ref[0:1, :]                        # (1, tile_b)
    x1 = x_ref[1:2, :]                        # (1, tile_b)

    # Layer 1: K=2 contraction on the VPU (two broadcast FMAs); bias + ReLU +
    # bf16 downcast fused into the same elementwise pass, so the hidden
    # activation is materialized once, in bf16.
    y = jnp.maximum(
        w1_ref[:, 0:1] * x0 + w1_ref[:, 1:2] * x1 + b1_ref[...], 0.0
    ).astype(jnp.bfloat16)                    # (m_pad, tile_b) bf16

    # Layers 2 & 3: bf16 MXU matmuls with f32 accumulation; bias/ReLU/cast fused.
    y = jnp.maximum(
        jnp.dot(w2_ref[...], y, preferred_element_type=jnp.float32) + b2_ref[...],
        0.0).astype(jnp.bfloat16)
    y = jnp.maximum(
        jnp.dot(w3_ref[...], y, preferred_element_type=jnp.float32) + b3_ref[...],
        0.0).astype(jnp.bfloat16)

    # Output layer (m -> 1): (1, m_pad) @ (m_pad, tile_b) -> lane-dense (1, tile_b).
    out = jnp.dot(w7_ref[...], y, preferred_element_type=jnp.float32) + b7_ref[0]
    o_ref[...] = out.astype(o_ref.dtype)


def _pad2(w, rows, cols):
    out = jnp.zeros((rows, cols), w.dtype)
    return out.at[:w.shape[0], :w.shape[1]].set(w)


def _num_tensorcores():
    """Best-effort TensorCore count; defaults to 1 (v5e/v6e)."""
    try:
        info = pltpu.get_tpu_info()
        for name in ("num_cores", "core_count", "num_tensorcores",
                     "tensor_core_count", "cores_per_chip", "num_cores_per_chip"):
            v = getattr(info, name, None)
            if isinstance(v, int) and v >= 1:
                return v
    except Exception:
        pass
    try:
        kind = jax.devices()[0].device_kind.lower()
        if "7x" in kind or "v7" in kind:
            return 2
    except Exception:
        pass
    return 1


def prepare_dgm_params(params):
    """Pad / cast the torch-layout weights once (hoisted out of the hot path)."""
    m = params["w2"].shape[0]
    # Pad hidden width only to the sublane quantum (16 covers f32 (8) and bf16
    # (16) packing); the MXU eats the K<128 underfill -- it has huge slack here.
    m_pad = 16 * pl.cdiv(max(m, 1), 16)
    din = params["w1"].shape[1]

    prepped = {
        "m": m,
        "m_pad": m_pad,
        "din": din,
        "w1": _pad2(params["w1"].astype(jnp.float32), m_pad, din),            # (m_pad, 2) f32
        "b1": _pad2(params["b1"].reshape(m, 1).astype(jnp.float32), m_pad, 1),
        "w2": _pad2(params["w2"], m_pad, m_pad).astype(jnp.bfloat16),
        "b2": _pad2(params["b2"].reshape(m, 1).astype(jnp.float32), m_pad, 1),
        "w3": _pad2(params["w3"], m_pad, m_pad).astype(jnp.bfloat16),
        "b3": _pad2(params["b3"].reshape(m, 1).astype(jnp.float32), m_pad, 1),
        "w7": _pad2(params["w7"].reshape(1, m), 1, m_pad).astype(jnp.bfloat16),  # (1, m_pad) bf16
        "b7": params["b7"].reshape(1).astype(jnp.float32),                       # SMEM scalar
    }
    return prepped


def dgm_forward(x, prepped, *, tile_b=2048):
    """x: (N, 2) float32.  prepped: output of prepare_dgm_params."""
    N, din = x.shape
    assert din == prepped["din"] == 2
    m_pad = prepped["m_pad"]

    # Lane-tile: multiple of 128, capped at tile_b.  Split the batch across
    # tiles only when the chip has >1 TensorCore (v7x) -- on single-TC chips the
    # grid is a serial loop and a forced split just adds per-step overhead.
    n_cores = _num_tensorcores()
    if n_cores >= 2:
        per_core = 128 * pl.cdiv(pl.cdiv(N, n_cores), 128)
        tile = min(tile_b, max(128, per_core))
    else:
        tile = min(tile_b, max(128, 128 * pl.cdiv(N, 128)))
    n_tiles = pl.cdiv(N, tile)
    n_pad = n_tiles * tile

    # Batch on lanes; padded batch columns are discarded after the kernel.
    xt = jnp.zeros((din, n_pad), jnp.float32).at[:, :N].set(x.T.astype(jnp.float32))

    full = lambda i: (0, 0)      # weights/biases resident across all batch tiles
    batch = lambda i: (0, i)     # tile over batch (lane) axis

    flops = 2 * n_pad * (din * m_pad + 2 * m_pad * m_pad + m_pad)
    bytes_accessed = (
        (xt.size + n_pad) * 4
        + (prepped["w2"].size + prepped["w3"].size + prepped["w7"].size) * 2
        + (prepped["w1"].size + prepped["b1"].size + prepped["b2"].size
           + prepped["b3"].size + 1) * 4
    )

    out = pl.pallas_call(
        dgm_kernel,
        out_shape=jax.ShapeDtypeStruct((1, n_pad), jnp.float32),
        grid_spec=pltpu.PrefetchScalarGridSpec(
            num_scalar_prefetch=0,
            grid=(n_tiles,),
            in_specs=[
                pl.BlockSpec((din, tile), batch),        # x (batch on lanes)
                pl.BlockSpec((m_pad, din), full),        # w1 (f32)
                pl.BlockSpec((m_pad, 1), full),          # b1
                pl.BlockSpec((m_pad, m_pad), full),      # w2 (bf16)
                pl.BlockSpec((m_pad, 1), full),          # b2
                pl.BlockSpec((m_pad, m_pad), full),      # w3 (bf16)
                pl.BlockSpec((m_pad, 1), full),          # b3
                pl.BlockSpec((1, m_pad), full),          # w7 row (bf16)
                pl.BlockSpec(memory_space=pltpu.MemorySpace.SMEM),  # b7 scalar
            ],
            out_specs=pl.BlockSpec((1, tile), batch),    # lane-dense output slab
        ),
        compiler_params=pltpu.CompilerParams(
            dimension_semantics=("parallel",)),
        cost_estimate=pl.CostEstimate(flops=flops, transcendentals=0,
                                      bytes_accessed=bytes_accessed),
    )(xt, prepped["w1"], prepped["b1"], prepped["w2"], prepped["b2"],
      prepped["w3"], prepped["b3"], prepped["w7"], prepped["b7"])

    return out[0, :N].reshape(N, 1)


def init_params(key, m):
    """Mirrors the PyTorch module: weights ~ N(0, 0.1), biases = 0.
    Stored in torch layout (out_features, in_features)."""
    k1, k2, k3, k7 = jax.random.split(key, 4)
    std = 0.1
    return {
        "w1": std * jax.random.normal(k1, (m, 2), jnp.float32),
        "b1": jnp.zeros((m,), jnp.float32),
        "w2": std * jax.random.normal(k2, (m, m), jnp.float32),
        "b2": jnp.zeros((m,), jnp.float32),
        "w3": std * jax.random.normal(k3, (m, m), jnp.float32),
        "b3": jnp.zeros((m,), jnp.float32),
        "w7": std * jax.random.normal(k7, (1, m), jnp.float32),
        "b7": jnp.zeros((1,), jnp.float32),
    }


def dgm_reference_f32(x, p):
    y = jnp.maximum(x @ p["w1"].T + p["b1"], 0.0)
    y = jnp.maximum(y @ p["w2"].T + p["b2"], 0.0)
    y = jnp.maximum(y @ p["w3"].T + p["b3"], 0.0)
    return y @ p["w7"].T + p["b7"]


def dgm_reference_bf16(x, p):
    """Mirrors the kernel's numerics: f32 VPU layer 1, bf16 activations/weights
    for layers 2/3/7 with f32 accumulation."""
    y = jnp.maximum(x[:, 0:1] * p["w1"][:, 0] + x[:, 1:2] * p["w1"][:, 1] + p["b1"],
                    0.0).astype(jnp.bfloat16)
    y = jnp.maximum(
        jnp.dot(y, p["w2"].T.astype(jnp.bfloat16),
                preferred_element_type=jnp.float32) + p["b2"], 0.0).astype(jnp.bfloat16)
    y = jnp.maximum(
        jnp.dot(y, p["w3"].T.astype(jnp.bfloat16),
                preferred_element_type=jnp.float32) + p["b3"], 0.0).astype(jnp.bfloat16)
    return jnp.dot(y, p["w7"].T.astype(jnp.bfloat16),
                   preferred_element_type=jnp.float32) + p["b7"]


if __name__ == "__main__":
    m = 32      # hidden width
    N = 64      # batch of (t, x) collocation points

    key = jax.random.PRNGKey(0)
    kp, kx = jax.random.split(key)
    params = init_params(kp, m)
    x = jax.random.normal(kx, (N, 2), jnp.float32)

    prepped = prepare_dgm_params(params)     # pad/cast weights once
    fwd = jax.jit(functools.partial(dgm_forward, prepped=prepped))

    out = jax.block_until_ready(fwd(x))
    assert out.shape == (N, 1)

    ref_bf16 = dgm_reference_bf16(x, params)
    ref_f32 = dgm_reference_f32(x, params)
    assert jnp.allclose(out, ref_bf16, atol=2e-3, rtol=2e-3)   # same-numerics check
    assert jnp.allclose(out, ref_f32, atol=3e-2, rtol=3e-2)    # semantics sanity check

    print("KERNEL_OK")
</pallas_src>

<mosaic_0001>
module attributes {stable_mosaic.version = 11 : i64} {
  func.func @dgm_kernel(%arg0: i32, %arg1: memref<2x128xf32, #tpu.memory_space<vmem>>, %arg2: memref<32x2xf32, #tpu.memory_space<vmem>>, %arg3: memref<32x1xf32, #tpu.memory_space<vmem>>, %arg4: memref<32x32xbf16, #tpu.memory_space<vmem>>, %arg5: memref<32x1xf32, #tpu.memory_space<vmem>>, %arg6: memref<32x32xbf16, #tpu.memory_space<vmem>>, %arg7: memref<32x1xf32, #tpu.memory_space<vmem>>, %arg8: memref<1x32xbf16, #tpu.memory_space<vmem>>, %arg9: memref<1xf32, #tpu.memory_space<smem>>, %arg10: memref<1x128xf32, #tpu.memory_space<vmem>>) attributes {dimension_semantics = [#tpu.dimension_semantics<parallel>], iteration_bounds = array<i64: 1>, scalar_prefetch = 0 : i64, scratch_operands = 0 : i64, tpu.core_type = #tpu.core_type<tc>, window_params = [{transform_indices = @transform_0, window_bounds = array<i64: 2, 128>}, {pipeline_mode = #tpu.pipeline_mode<synchronous>, transform_indices = @transform_1, window_bounds = array<i64: 32, 2>}, {pipeline_mode = #tpu.pipeline_mode<synchronous>, transform_indices = @transform_2, window_bounds = array<i64: 32, 1>}, {pipeline_mode = #tpu.pipeline_mode<synchronous>, transform_indices = @transform_3, window_bounds = array<i64: 32, 32>}, {pipeline_mode = #tpu.pipeline_mode<synchronous>, transform_indices = @transform_4, window_bounds = array<i64: 32, 1>}, {pipeline_mode = #tpu.pipeline_mode<synchronous>, transform_indices = @transform_5, window_bounds = array<i64: 32, 32>}, {pipeline_mode = #tpu.pipeline_mode<synchronous>, transform_indices = @transform_6, window_bounds = array<i64: 32, 1>}, {pipeline_mode = #tpu.pipeline_mode<synchronous>, transform_indices = @transform_7, window_bounds = array<i64: 1, 32>}, {transform_indices = @transform_8, window_bounds = array<i64: 1>}, {transform_indices = @transform_9, window_bounds = array<i64: 1, 128>}]} {
    %c0 = arith.constant 0 : index
    %c0_0 = arith.constant 0 : index
    %0 = vector.load %arg1[%c0, %c0_0] : memref<2x128xf32, #tpu.memory_space<vmem>>, vector<1x128xf32>
    %c1 = arith.constant 1 : index
    %c0_1 = arith.constant 0 : index
    %1 = vector.load %arg1[%c1, %c0_1] : memref<2x128xf32, #tpu.memory_space<vmem>>, vector<1x128xf32>
    %c0_2 = arith.constant 0 : index
    %c0_3 = arith.constant 0 : index
    %2 = vector.load %arg2[%c0_2, %c0_3] : memref<32x2xf32, #tpu.memory_space<vmem>>, vector<32x1xf32>
    %3 = vector.broadcast %2 : vector<32x1xf32> to vector<32x128xf32>
    %4 = vector.broadcast %0 : vector<1x128xf32> to vector<32x128xf32>
    %5 = arith.mulf %3, %4 : vector<32x128xf32>
    %c0_4 = arith.constant 0 : index
    %c1_5 = arith.constant 1 : index
    %6 = vector.load %arg2[%c0_4, %c1_5] : memref<32x2xf32, #tpu.memory_space<vmem>>, vector<32x1xf32>
    %7 = vector.broadcast %6 : vector<32x1xf32> to vector<32x128xf32>
    %8 = vector.broadcast %1 : vector<1x128xf32> to vector<32x128xf32>
    %9 = arith.mulf %7, %8 : vector<32x128xf32>
    %10 = arith.addf %5, %9 : vector<32x128xf32>
    %c0_6 = arith.constant 0 : index
    %c0_7 = arith.constant 0 : index
    %11 = vector.load %arg3[%c0_6, %c0_7] : memref<32x1xf32, #tpu.memory_space<vmem>>, vector<32x1xf32>
    %12 = vector.broadcast %11 : vector<32x1xf32> to vector<32x128xf32>
    %13 = arith.addf %10, %12 : vector<32x128xf32>
    %cst = arith.constant 0.000000e+00 : f32
    %14 = vector.broadcast %cst : f32 to vector<32x128xf32>
    %15 = arith.maximumf %13, %14 : vector<32x128xf32>
    %16 = arith.truncf %15 : vector<32x128xf32> to vector<32x128xbf16>
    %c0_8 = arith.constant 0 : index
    %c0_9 = arith.constant 0 : index
    %17 = vector.load %arg4[%c0_8, %c0_9] : memref<32x32xbf16, #tpu.memory_space<vmem>>, vector<32x32xbf16>
    %cst_10 = arith.constant dense<0.000000e+00> : vector<32x128xf32>
    %18 = tpu.matmul %17, %16, %cst_10 {dimension_numbers = #tpu.dot_dimension_numbers<[1], [0], [0], [1], [0, 0, 1, 1], [], []>} : vector<32x32xbf16>, vector<32x128xbf16>, vector<32x128xf32> -> vector<32x128xf32>
    %c0_11 = arith.constant 0 : index
    %c0_12 = arith.constant 0 : index
    %19 = vector.load %arg5[%c0_11, %c0_12] : memref<32x1xf32, #tpu.memory_space<vmem>>, vector<32x1xf32>
    %20 = vector.broadcast %19 : vector<32x1xf32> to vector<32x128xf32>
    %21 = arith.addf %18, %20 : vector<32x128xf32>
    %cst_13 = arith.constant 0.000000e+00 : f32
    %22 = vector.broadcast %cst_13 : f32 to vector<32x128xf32>
    %23 = arith.maximumf %21, %22 : vector<32x128xf32>
    %24 = arith.truncf %23 : vector<32x128xf32> to vector<32x128xbf16>
    %c0_14 = arith.constant 0 : index
    %c0_15 = arith.constant 0 : index
    %25 = vector.load %arg6[%c0_14, %c0_15] : memref<32x32xbf16, #tpu.memory_space<vmem>>, vector<32x32xbf16>
    %cst_16 = arith.constant dense<0.000000e+00> : vector<32x128xf32>
    %26 = tpu.matmul %25, %24, %cst_16 {dimension_numbers = #tpu.dot_dimension_numbers<[1], [0], [0], [1], [0, 0, 1, 1], [], []>} : vector<32x32xbf16>, vector<32x128xbf16>, vector<32x128xf32> -> vector<32x128xf32>
    %c0_17 = arith.constant 0 : index
    %c0_18 = arith.constant 0 : index
    %27 = vector.load %arg7[%c0_17, %c0_18] : memref<32x1xf32, #tpu.memory_space<vmem>>, vector<32x1xf32>
    %28 = vector.broadcast %27 : vector<32x1xf32> to vector<32x128xf32>
    %29 = arith.addf %26, %28 : vector<32x128xf32>
    %cst_19 = arith.constant 0.000000e+00 : f32
    %30 = vector.broadcast %cst_19 : f32 to vector<32x128xf32>
    %31 = arith.maximumf %29, %30 : vector<32x128xf32>
    %32 = arith.truncf %31 : vector<32x128xf32> to vector<32x128xbf16>
    %c0_20 = arith.constant 0 : index
    %c0_21 = arith.constant 0 : index
    %33 = vector.load %arg8[%c0_20, %c0_21] : memref<1x32xbf16, #tpu.memory_space<vmem>>, vector<1x32xbf16>
    %cst_22 = arith.constant dense<0.000000e+00> : vector<1x128xf32>
    %34 = tpu.matmul %33, %32, %cst_22 {dimension_numbers = #tpu.dot_dimension_numbers<[1], [0], [0], [1], [0, 0, 1, 1], [], []>} : vector<1x32xbf16>, vector<32x128xbf16>, vector<1x128xf32> -> vector<1x128xf32>
    %c0_23 = arith.constant 0 : index
    %35 = memref.load %arg9[%c0_23] : memref<1xf32, #tpu.memory_space<smem>>
    %36 = vector.broadcast %35 : f32 to vector<1x128xf32>
    %37 = arith.addf %34, %36 : vector<1x128xf32>
    %c0_24 = arith.constant 0 : index
    %c0_25 = arith.constant 0 : index
    %38 = vector.load %arg10[%c0_24, %c0_25] : memref<1x128xf32, #tpu.memory_space<vmem>>, vector<1x128xf32>
    tpu.vector_store %arg10[%c0_24, %c0_25], %37 {strides = array<i32>} : memref<1x128xf32, #tpu.memory_space<vmem>>, vector<1x128xf32>,
    return
  }
  func.func @transform_0(%arg0: i32) -> (i32, i32) {
    %c0_i32 = arith.constant 0 : i32
    %c0_i32_0 = arith.constant 0 : i32
    return %c0_i32, %arg0 : i32, i32
  }
  func.func @transform_1(%arg0: i32) -> (i32, i32) {
    %c0_i32 = arith.constant 0 : i32
    %c0_i32_0 = arith.constant 0 : i32
    %c0_i32_1 = arith.constant 0 : i32
    return %c0_i32, %c0_i32_0 : i32, i32
  }
  func.func @transform_2(%arg0: i32) -> (i32, i32) {
    %c0_i32 = arith.constant 0 : i32
    %c0_i32_0 = arith.constant 0 : i32
    %c0_i32_1 = arith.constant 0 : i32
    return %c0_i32, %c0_i32_0 : i32, i32
  }
  func.func @transform_3(%arg0: i32) -> (i32, i32) {
    %c0_i32 = arith.constant 0 : i32
    %c0_i32_0 = arith.constant 0 : i32
    %c0_i32_1 = arith.constant 0 : i32
    return %c0_i32, %c0_i32_0 : i32, i32
  }
  func.func @transform_4(%arg0: i32) -> (i32, i32) {
    %c0_i32 = arith.constant 0 : i32
    %c0_i32_0 = arith.constant 0 : i32
    %c0_i32_1 = arith.constant 0 : i32
    return %c0_i32, %c0_i32_0 : i32, i32
  }
  func.func @transform_5(%arg0: i32) -> (i32, i32) {
    %c0_i32 = arith.constant 0 : i32
    %c0_i32_0 = arith.constant 0 : i32
    %c0_i32_1 = arith.constant 0 : i32
    return %c0_i32, %c0_i32_0 : i32, i32
  }
  func.func @transform_6(%arg0: i32) -> (i32, i32) {
    %c0_i32 = arith.constant 0 : i32
    %c0_i32_0 = arith.constant 0 : i32
    %c0_i32_1 = arith.constant 0 : i32
    return %c0_i32, %c0_i32_0 : i32, i32
  }
  func.func @transform_7(%arg0: i32) -> (i32, i32) {
    %c0_i32 = arith.constant 0 : i32
    %c0_i32_0 = arith.constant 0 : i32
    %c0_i32_1 = arith.constant 0 : i32
    return %c0_i32, %c0_i32_0 : i32, i32
  }
  func.func @transform_8(%arg0: i32) -> i32 {
    %c0_i32 = arith.constant 0 : i32
    %c0_i32_0 = arith.constant 0 : i32
    return %c0_i32 : i32
  }
  func.func @transform_9(%arg0: i32) -> (i32, i32) {
    %c0_i32 = arith.constant 0 : i32
    %c0_i32_0 = arith.constant 0 : i32
    return %c0_i32, %arg0 : i32, i32
  }
}

</mosaic_0001>

<bundles_post_ra>
// kernel: dgm_forward.1
= control target key start
LH: loop header
LB: loop body
LE: loop exit
PB: predicated region body
PF: predicated region fallthrough
CT: control target
= control target key end

     0   :  { %v440_v0 = vmov 1   ;;  %v441_v4 = vmov 0   ;;  %vm168_vm0 = vcmask 261120   ;;  %vm443_vm1 = vmmov 0   ;;  %s574_s1 = inlined_call_operand.vmem [shape: f32[32,2], index: 1, kind: input, shape index: {}]   ;;  %s575_s2 = inlined_call_operand.vmem [shape: f32[32,1], index: 2, kind: input, shape index: {}, may-alias: {2,4,6}]   ;;  %s576_s4 = inlined_call_operand.vmem [shape: f32[32,1], index: 4, kind: input, shape index: {}, may-alias: {2,4,6}]   ;;  %s577_s6 = inlined_call_operand.vmem [shape: f32[32,1], index: 6, kind: input, shape index: {}, may-alias: {2,4,6}]   ;;  %s578_s3 = inlined_call_operand.vmem [shape: bf16[32,32], index: 3, kind: input, shape index: {}]   ;;  %s579_s0 = inlined_call_operand.vmem [shape: f32[2,128], index: 0, kind: input, shape index: {}]   ;;  %s580_s5 = inlined_call_operand.vmem [shape: bf16[32,32], index: 5, kind: input, shape index: {}]   ;;  %s581_s7 = inlined_call_operand.vmem [shape: bf16[1,32], index: 7, kind: input, shape index: {}]   ;;  %s582_s8 = inlined_call_operand.<no memory space> [shape: f32[1], index: 8, kind: input, shape index: {}]   ;;  %s583_s9 = inlined_call_operand.vmem [shape: f32[1,128], index: 9, kind: output, shape index: {}]  }
   0x1   :  { %432 = vset.pattern.permute.xlu0 %v440_v0  ;;  %430 = vset.pattern.permute.xlu1 %v440_v0  ;;  %v38_v1 = vld [vmem:[%s574_s1 + $0x10] sm:$0xff]  ;;  %v36_v2 = vld [vmem:[%s574_s1] sm:$0xff]  ;;  %v37_v3 = vld [vmem:[%s574_s1 + $0x8] sm:$0xff] }
   0x2   :  { %77 = vperm.xlu0 %432, %v38_v1   ;;  %69 = vperm.xlu1 %430, %v36_v2   ;;  %v39_v5 = vld [vmem:[%s574_s1 + $0x18] sm:$0xff]  ;;  %v97_v6 = vld [vmem:[%s575_s2 + $0x8] sm:$0xff]  ;;  %v96_v7 = vld [vmem:[%s575_s2] sm:$0xff] }
   0x3   :  { %v134_v8 = vld [vmem:[%s576_s4] sm:$0xff]  ;;  %v98_v9 = vld [vmem:[%s575_s2 + $0x10] sm:$0xff]  ;;  %v99_v11 = vld [vmem:[%s575_s2 + $0x18] sm:$0xff] }
   0x4   :  { %v136_v10 = vld [vmem:[%s576_s4 + $0x10] sm:$0xff]  ;;  %v234_v12 = vld [vmem:[%s577_s6] sm:$0xff]  ;;  %v135_v13 = vld [vmem:[%s576_s4 + $0x8] sm:$0xff] }
   0x5   :  { %v236_v14 = vld [vmem:[%s577_s6 + $0x10] sm:$0xff]  ;;  %v137_v15 = vld [vmem:[%s576_s4 + $0x18] sm:$0xff]  ;;  %v436_v16 = vld [vmem:[%s578_s3] sm:$0xff]  }
   0x6   :  { %433 = vset.pattern.permute.xlu0 %v441_v4  ;;  %73 = vperm.xlu1 %430, %v37_v3   ;;  %v235_v17 = vld [vmem:[%s577_s6 + $0x8] sm:$0xff]  ;;  %v237_v18 = vld [vmem:[%s577_s6 + $0x18] sm:$0xff]  ;;  %v380_v25 = vld [vmem:[%s579_s0] ss:$0 sm:$0xff] }
   0x7   :  { %42 = vperm.xlu0 %433, %v36_v2   ;;  %406 = vmatprep.mubr.msk.bf16.mxu0 %vm168_vm0, %v436_v16  ;;  %v381_v27 = vld [vmem:[%s579_s0 + $0x1] ss:$0 sm:$0xff]  ;;  %v437_v55 = vld [vmem:[%s578_s3 + $0x8] sm:$0xff]  }
   0x8   :  { %v438_v56 = vld [vmem:[%s580_s5] sm:$0xff]  }
   0x9   :  { %414 = vmatprep.mubr.msk.bf16.mxu1 %vm168_vm0, %v438_v56 }
   0xa   :  { %431 = vset.pattern.permute.xlu1 %v441_v4 }
   0xb   :  { %47 = vperm.xlu0 %433, %v37_v3   ;;  %57 = vperm.xlu1 %431, %v39_v5  }
   0xf   :  { %52 = vperm.xlu0 %433, %v38_v1   ;;  %434 = vset.pattern.permute.xlu1 %v440_v0 }
  0x10   :  { %81 = vperm.xlu1 %434, %v39_v5  }
  0x13   :  { %107 = vperm.xlu0 %433, %v97_v6  }
  0x14   :  { %435 = vset.pattern.permute.xlu1 %v441_v4 }
  0x15   :  { %102 = vperm.xlu1 %435, %v96_v7  }
  0x17   :  { %140 = vperm.xlu0 %433, %v134_v8  }
  0x19   :  { %112 = vperm.xlu1 %435, %v98_v9  }
  0x1b   :  { %150 = vperm.xlu0 %433, %v136_v10  }
  0x1d   :  { %117 = vperm.xlu1 %435, %v99_v11   ;;  %v439_v11 = vld [vmem:[%s580_s5 + $0x8] sm:$0xff]  }
  0x1f   :  { %240 = vperm.xlu0 %433, %v234_v12   ;;  %v442_v12 = vmov 0.0  }
  0x21   :  { %145 = vperm.xlu1 %435, %v135_v13  }
  0x23   :  { %250 = vperm.xlu0 %433, %v236_v14  }
  0x25   :  { %155 = vperm.xlu1 %435, %v137_v15  }
  0x29   :  { %245 = vperm.xlu1 %435, %v235_v17  }
  0x2d   :  { %255 = vperm.xlu1 %435, %v237_v18  }
  0x81   :  { %v70_v19 = vpop.permute.xlu1 %69  ;;  %v78_v20 = vpop.permute.xlu0 %77 }
  0x82   :  { %v88_v32 = vmul.f32 %v381_v27, %v70_v19  ;;  %v90_v40 = vmul.f32 %v381_v27, %v78_v20 }
  0x85   :  { %v74_v21 = vpop.permute.xlu1 %73 }
  0x86   :  { %v43_v22 = vpop.permute.xlu0 %42  ;;  %v89_v29 = vmul.f32 %v381_v27, %v74_v21 }
  0x87   :  { %v64_v30 = vmul.f32 %v380_v25, %v43_v22 }
  0x89   :  { %v92_v36 = vadd.f32 %v88_v32, %v64_v30  ;;  %v331_v32 = vstv %s582_s8 }
  0x8a   :  { %v48_v23 = vpop.permute.xlu0 %47  ;;  %v58_v24 = vpop.permute.xlu1 %57 }
  0x8b   :  { %v65_v26 = vmul.f32 %v380_v25, %v48_v23  ;;  %v67_v45 = vmul.f32 %v380_v25, %v58_v24 }
  0x8d   :  { %v93_v33 = vadd.f32 %v89_v29, %v65_v26 }
  0x8e   :  { %v53_v28 = vpop.permute.xlu0 %52 }
  0x8f   :  { %v82_v31 = vpop.permute.xlu1 %81  ;;  %v66_v38 = vmul.f32 %v380_v25, %v53_v28 }
  0x90   :  { %v91_v41 = vmul.f32 %v381_v27, %v82_v31  ;;  %v329_v31 = vld [vmem:[%s581_s7] sm:$0x1] }
  0x91   :  { %v94_v46 = vadd.f32 %v90_v40, %v66_v38 }
  0x92   :  { %v108_v34 = vpop.permute.xlu0 %107  ;;  %v95_v49 = vadd.f32 %v91_v41, %v67_v45 }
  0x93   :  { %v121_v35 = vadd.f32 %v108_v34, %v93_v33 }
  0x94   :  { %v103_v37 = vpop.permute.xlu1 %102 }
  0x95   :  { %v120_v39 = vadd.f32 %v103_v37, %v92_v36  ;;  %v125_v42 = vmax.f32 %v121_v35, 0.0 }
  0x96   :  { %v141_v57 = vpop.permute.xlu0 %140 }
  0x97   :  { %v124_v43 = vmax.f32 %v120_v39, 0.0 }
  0x98   :  { %v113_v44 = vpop.permute.xlu1 %112 }
  0x99   :  { %v128_v47 = vpack.c.bf16 %v125_v42, %v124_v43  ;;  %v122_v48 = vadd.f32 %v113_v44, %v94_v46 }
  0x9a   :  { %v151_v59 = vpop.permute.xlu0 %150 }
  0x9b   :  { %402 = vmatprep.subr.bf16.mxu0 %v128_v47  ;;  %v126_v52 = vmax.f32 %v122_v48, 0.0 }
  0x9c   :  { %v118_v50 = vpop.permute.xlu1 %117  ;;  %403 = vmatpush3.bf16.msra.mxu0 %v128_v47 }
  0x9d   :  { %v123_v51 = vadd.f32 %v118_v50, %v95_v49 }
  0x9e   :  { %v241_v13 = vpop.permute.xlu0 %240 }
  0x9f   :  { %v127_v53 = vmax.f32 %v123_v51, 0.0 }
  0xa0   :  { %v146_v58 = vpop.permute.xlu1 %145 }
  0xa1   :  { %v129_v54 = vpack.c.bf16 %v127_v53, %v126_v52 }
  0xa2   :  { %v251_v15 = vpop.permute.xlu0 %250 }
  0xa3   :  { %404 = vmatprep.subr.bf16.mxu0 %v129_v54 }
  0xa4   :  { %405 = vmatpush3.bf16.msra.mxu0 %v129_v54  ;;  %v156_v63 = vpop.permute.xlu1 %155 }
  0xa5   :  { %418 = vmatprep.subr.bf16.mxu0 %v442_v12 }
  0xa7   :  { %407 = vmatmul.mubr.msk.bf16.vlgmr.msra.gmra.mrb[0].mxu0 %vm168_vm0, %v437_v55 }
  0xa8   :  { %422 = vmatprep.mubr.msk.bf16.mxu0 %vm443_vm1, %v442_v12  ;;  %v246_v14 = vpop.permute.xlu1 %245 }
  0xac   :  { %v256_v19 = vpop.permute.xlu1 %255 }
 0x17a   :  { %v408_v60 = vpop.f32.mrb[0].mxu0 }
 0x17b   :  { %v218_v61 = vadd.f32 %v408_v60, %v151_v59  ;;  %v209_v62 = vpop.f32.mrb[1].mxu0 }
 0x17c   :  { %v210_v0 = vadd.f32 %v209_v62, %v141_v57  ;;  %v409_v1 = vpop.f32.mrb[2].mxu0 }
 0x17d   :  { %v221_v2 = vadd.f32 %v409_v1, %v156_v63  ;;  %v212_v3 = vpop.f32.mrb[3].mxu0  ;;  %v226_v5 = vmax.f32 %v218_v61, 0.0 }
 0x17e   :  { %v213_v4 = vadd.f32 %v212_v3, %v146_v58  ;;  %v224_v7 = vmax.f32 %v210_v0, 0.0 }
 0x17f   :  { %v227_v6 = vmax.f32 %v221_v2, 0.0 }
 0x180   :  { %v225_v8 = vmax.f32 %v213_v4, 0.0 }
 0x181   :  { %v229_v9 = vpack.c.bf16 %v227_v6, %v226_v5 }
 0x182   :  { %v228_v10 = vpack.c.bf16 %v225_v8, %v224_v7 }
 0x184   :  { %410 = vmatprep.subr.bf16.mxu1 %v228_v10 }
 0x185   :  { %411 = vmatpush3.bf16.msra.mxu1 %v228_v10 }
 0x186   :  { %412 = vmatprep.subr.bf16.mxu1 %v229_v9 }
 0x189   :  { %413 = vmatpush3.bf16.msra.mxu1 %v229_v9 }
 0x18c   :  { %415 = vmatmul.mubr.msk.bf16.vlgmr.msra.gmra.mrb[0].mxu1 %vm168_vm0, %v439_v11 }
 0x25f   :  { %v416_v16 = vpop.f32.mrb[0].mxu1 }
 0x260   :  { %v317_v17 = vadd.f32 %v416_v16, %v251_v15  ;;  %v308_v18 = vpop.f32.mrb[1].mxu1 }
 0x261   :  { %v309_v20 = vadd.f32 %v308_v18, %v241_v13  ;;  %v417_v21 = vpop.f32.mrb[2].mxu1 }
 0x262   :  { %v320_v22 = vadd.f32 %v417_v21, %v256_v19  ;;  %v311_v23 = vpop.f32.mrb[3].mxu1  ;;  %v325_v25 = vmax.f32 %v317_v17, 0.0 }
 0x263   :  { %v312_v24 = vadd.f32 %v311_v23, %v246_v14  ;;  %v323_v27 = vmax.f32 %v309_v20, 0.0 }
 0x264   :  { %v326_v26 = vmax.f32 %v320_v22, 0.0 }
 0x265   :  { %v324_v28 = vmax.f32 %v312_v24, 0.0 }
 0x266   :  { %v328_v29 = vpack.c.bf16 %v326_v26, %v325_v25 }
 0x267   :  { %v327_v30 = vpack.c.bf16 %v324_v28, %v323_v27 }
 0x269   :  { %419 = vmatpush3.bf16.msra.mxu0 %v327_v30 }
 0x26a   :  { %420 = vmatprep.subr.bf16.mxu0 %v442_v12 }
 0x26d   :  { %421 = vmatpush3.bf16.msra.mxu0 %v328_v29 }
 0x270   :  { %423 = vmatmul.mubr.msk.bf16.vlgmr.msra.gmra.mrb[4].mxu0 %vm168_vm0, %v329_v31 }
 0x343   :  { %v369_v33 = vpop.f32.mrb[4].mxu0 }
 0x344   :  { %v370_v34 = vadd.f32 %v369_v33, %v331_v32  ;;  %v424_v35 = vpop.f32.mrb[5].mxu0 }
 0x345   :  { %v372_v36 = vpop.f32.mrb[6].mxu0 }
 0x346   :  { %375 = vst [vmem:[%s583_s9] sm:$0x1] %v370_v34  ;;  %v425_v37 = vpop.f32.mrb[7].mxu0 }

</bundles_post_ra>
